<compile_context>
chip_gen: v5e
topology: v5e:2x2
jax: 0.10.0
libtpu: 0.0.40
codegen_flags: <defaults>
</compile_context>

<pallas_src>
import jax
import jax.numpy as jnp
from jax.experimental import pallas as pl
from jax.experimental.pallas import tpu as pltpu

LEAKY_SLOPE = 0.01   # nn.LeakyReLU() default negative_slope
LANE = 128
SUBLANE = 8
TARGET_BLOCK_BYTES = 2 * 1024 * 1024   # ~2 MiB per block (f32)


def _complex_add_kernel(x_ref, o_ref):
    x = x_ref[...]
    # 3*relu(x) + leaky_relu(x)  ==  where(x>=0, 4x, 0.01x)  (exact in fp32)
    o_ref[...] = jnp.where(x >= 0, x * 4.0, x * LEAKY_SLOPE).astype(o_ref.dtype)


def complex_add(x):
    """Elementwise ComplexAdd forward. x: any shape, float32 -> same shape."""
    orig_shape = x.shape
    total = x.size
    flat = x.reshape(-1)

    # Lane-dense column width: multiple of 128, shrunk for tiny inputs so we
    # don't over-pad.
    cols = 1024
    while cols > LANE and total < cols * SUBLANE:
        cols //= 2

    rows = pl.cdiv(total, cols)

    # Row tile targeting ~2 MiB per f32 block; multiple of 8 sublanes.
    target_rows = max(SUBLANE, TARGET_BLOCK_BYTES // (cols * flat.dtype.itemsize))
    tr = min(target_rows, rows)
    tr = max(SUBLANE, (tr // SUBLANE) * SUBLANE)

    # Pad rows up to a multiple of tr -> every block is full, no masked stores.
    padded_rows = pl.cdiv(rows, tr) * tr
    pad_amount = padded_rows * cols - total
    if pad_amount:
        flat = jnp.concatenate(
            [flat, jnp.zeros((pad_amount,), dtype=flat.dtype)])
    x2 = flat.reshape(padded_rows, cols)

    grid = (padded_rows // tr,)

    out2 = pl.pallas_call(
        _complex_add_kernel,
        out_shape=jax.ShapeDtypeStruct((padded_rows, cols), x2.dtype),
        grid=grid,
        in_specs=[pl.BlockSpec((tr, cols), lambda i: (i, 0))],
        out_specs=pl.BlockSpec((tr, cols), lambda i: (i, 0)),
        compiler_params=pltpu.CompilerParams(
            dimension_semantics=("parallel",)),
    )(x2)

    return out2.reshape(-1)[:total].reshape(orig_shape)


def _reference(x):
    a = jnp.maximum(x, 0.0)
    b = jnp.where(x >= 0, x, x * LEAKY_SLOPE)
    d = jnp.maximum(x, 0.0)
    e = jnp.maximum(x, 0.0)
    return (a + b) + (d + e)


if __name__ == "__main__":
    key = jax.random.PRNGKey(0)
    # Small NCHW input consistent with the module's elementwise forward.
    x = jax.random.normal(key, (2, 4, 16, 16), dtype=jnp.float32)

    out = complex_add(x)
    out = jax.block_until_ready(out)

    ref = _reference(x)
    assert out.shape == x.shape
    assert jnp.allclose(out, ref, atol=1e-6, rtol=1e-6)

    print("KERNEL_OK")
</pallas_src>

<mosaic_0001>
module attributes {stable_mosaic.version = 11 : i64} {
  func.func @_complex_add_kernel(%arg0: i32, %arg1: memref<8x256xf32, #tpu.memory_space<vmem>>, %arg2: memref<8x256xf32, #tpu.memory_space<vmem>>) attributes {dimension_semantics = [#tpu.dimension_semantics<parallel>], iteration_bounds = array<i64: 1>, scalar_prefetch = 0 : i64, scratch_operands = 0 : i64, tpu.core_type = #tpu.core_type<tc>, window_params = [{transform_indices = @transform_0, window_bounds = array<i64: 8, 256>}, {transform_indices = @transform_1, window_bounds = array<i64: 8, 256>}]} {
    %c0 = arith.constant 0 : index
    %c0_0 = arith.constant 0 : index
    %0 = vector.load %arg1[%c0, %c0_0] : memref<8x256xf32, #tpu.memory_space<vmem>>, vector<8x256xf32>
    %cst = arith.constant 0.000000e+00 : f32
    %1 = vector.broadcast %cst : f32 to vector<8x256xf32>
    %2 = arith.cmpf oge, %0, %1 : vector<8x256xf32>
    %cst_1 = arith.constant 4.000000e+00 : f32
    %3 = vector.broadcast %cst_1 : f32 to vector<8x256xf32>
    %4 = arith.mulf %0, %3 : vector<8x256xf32>
    %cst_2 = arith.constant 0.00999999977 : f32
    %5 = vector.broadcast %cst_2 : f32 to vector<8x256xf32>
    %6 = arith.mulf %0, %5 : vector<8x256xf32>
    %7 = arith.select %2, %4, %6 : vector<8x256xi1>, vector<8x256xf32>
    %c0_3 = arith.constant 0 : index
    %c0_4 = arith.constant 0 : index
    %8 = vector.load %arg2[%c0_3, %c0_4] : memref<8x256xf32, #tpu.memory_space<vmem>>, vector<8x256xf32>
    tpu.vector_store %arg2[%c0_3, %c0_4], %7 {strides = array<i32>} : memref<8x256xf32, #tpu.memory_space<vmem>>, vector<8x256xf32>,
    return
  }
  func.func @transform_0(%arg0: i32) -> (i32, i32) {
    %c0_i32 = arith.constant 0 : i32
    %c0_i32_0 = arith.constant 0 : i32
    return %arg0, %c0_i32 : i32, i32
  }
  func.func @transform_1(%arg0: i32) -> (i32, i32) {
    %c0_i32 = arith.constant 0 : i32
    %c0_i32_0 = arith.constant 0 : i32
    return %arg0, %c0_i32 : i32, i32
  }
}

</mosaic_0001>

<bundles_post_ra>
// kernel: tpu_custom_call.1
= control target key start
LH: loop header
LB: loop body
LE: loop exit
PB: predicated region body
PF: predicated region fallthrough
CT: control target
= control target key end

     0   :  { %6 = vsyncpa [#allocation3], 0  ;;  %s124_s0 = inlined_call_operand.hbm [shape: f32[8,256], index: 0, kind: input, shape index: {}]   ;;  %s125_s1 = inlined_call_operand.hbm [shape: f32[8,256], index: 1, kind: output, shape index: {}]  }
   0x1   :  { %7 = vsyncpa [#allocation4], 0  ;;  %s13_s8 = sshll.u32 %s124_s0, 4  ;;  %s106_s9 = smov [#allocation2]   ;;  %s14_s8 = int_to_ptr.hbm [resolvable:$true] %s13_s8 }
   0x2   :  { %s15_s10 = sshll.u32 %s106_s9, 4  ;;  %s16_s10 = int_to_ptr.vmem [resolvable:$true] %s15_s10 }
   0x3   :  { %18 = dma.hbm_to_vmem [thread:$0]  %s14_s8, 256, %s16_s10, [#allocation3]  }
   0x4   :  { %102 = dma.done.wait [#allocation3], 256  }
   0x5   :  { %103 = vsyncadd [#allocation3], 4294967040  ;;  %v23_v0 = vld [vmem:[#allocation2] sm:$0xff]  ;;  %v24_v1 = vld [vmem:[#allocation2 + $0x8] sm:$0xff]  ;;  %s107_s11 = smov [#allocation5]   ;;  %s42_s15 = sshll.u32 %s125_s1, 4  ;;  %s43_s15 = int_to_ptr.hbm [resolvable:$true] %s42_s15 }
   0x6   :  { %s40_s12 = sshll.u32 %s107_s11, 4  ;;  %vm25_vm0 = vcmp.ge.f32.partialorder %v23_v0, 0.0  ;;  %v27_v2 = vmul.f32 4.0, %v23_v0  ;;  %v29_v3 = vmul.f32 0.01, %v23_v0  ;;  %vm26_vm1 = vcmp.ge.f32.partialorder %v24_v1, 0.0  ;;  %s41_s12 = int_to_ptr.vmem [resolvable:$true] %s40_s12 }
   0x7   :  { %v28_v4 = vmul.f32 4.0, %v24_v1  ;;  %v30_v5 = vmul.f32 0.01, %v24_v1 }
   0x8   :  { %v31_v6 = vsel %vm25_vm0, %v27_v2, %v29_v3 }
   0x9   :  { %33 = vst [vmem:[#allocation5] sm:$0xff] %v31_v6  ;;  %v32_v7 = vsel %vm26_vm1, %v28_v4, %v30_v5 }
   0xa   :  { %34 = vst [vmem:[#allocation5 + $0x8] sm:$0xff] %v32_v7 }
   0xb   :  { %45 = dma.vmem_to_hbm [thread:$0]  %s41_s12, 256, %s43_s15, [#allocation4]  }
   0xc   :  { %104 = dma.done.wait [#allocation4], 256  }
   0xd   :  { %105 = vsyncadd [#allocation4], 4294967040 }
   0xe   :  { %50 = vsyncpa [#allocation3], 1 }
   0xf   :  { %51 = vsyncpa [#allocation4], 1 }

</bundles_post_ra>
